<compile_context>
chip_gen: v6e
topology: v6e:2x2x1
jax: 0.10.0
libtpu: 0.0.40
codegen_flags: <defaults>
</compile_context>

<pallas_src>
import jax
import jax.numpy as jnp
from jax.experimental import pallas as pl
from jax.experimental.pallas import tpu as pltpu


def patch_len(n, epochs):
    """Split n rows into `epochs` patches (remainder spread over the first ones)."""
    list_len = []
    base = n // epochs
    for _ in range(epochs):
        list_len.append(base)
    for i in range(n - base * epochs):
        list_len[i] += 1
    if sum(list_len) != n:
        raise ValueError("check your epochs and axis should be split again")
    return list_len


def _gram_kernel(x_ref, o_ref):
    # x_ref: (gB, n, P) VMEM tile -- gB grams of one block.
    # o_ref: (gB, n, n) VMEM tile.
    xb = x_ref[...]
    # Batched Gram: batch over dim 0, contract the P (last) dim of both
    # operands -- no materialized transpose before the MXU push.
    g = jax.lax.dot_general(
        xb, xb,
        dimension_numbers=(((2,), (2,)), ((0,), (0,))),
        preferred_element_type=jnp.float32,
    )
    o_ref[...] = g.astype(o_ref.dtype)


def e2r_forward(x, epochs):
    """Pallas implementation of E2R.forward.

    x: (B, 1, N, P) (or any shape whose squeeze() gives (B, N, P) or (N, P)).
    Returns: (B, epochs, n, n) with n = N // epochs.
    """
    epochs = int(epochs)
    x = jnp.squeeze(x)               # torch .squeeze(): drop all size-1 dims
    if x.ndim == 2:                  # batch of 1 was squeezed away
        x = x[None]
    B, N, P = x.shape

    lp = patch_len(N, epochs)
    # torch.stack in the reference requires all patches to have equal size.
    assert all(l == lp[0] for l in lp), "epochs must evenly divide x.shape[-2]"
    n = lp[0]

    # Contiguous row-split along dim=-2 == reshape; flatten (B, epochs) into
    # one gram axis of size G so the grid tiles both at once.
    G = B * epochs
    xg = x.reshape(G, n, P)

    # Pick the largest gram-block gB whose double-buffered in+out tiles stay
    # well under the smallest default scoped-VMEM limit (16 MiB on v5e).
    itemsize = jnp.dtype(x.dtype).itemsize
    per_gram_bytes = (n * P + n * n) * itemsize
    budget = 6 << 20                              # ~12 MiB once double-buffered
    gB = max(1, min(G, budget // max(per_gram_bytes, 1)))
    while G % gB:                                 # avoid ragged last block
        gB -= 1
    grid = (G // gB,)

    out = pl.pallas_call(
        _gram_kernel,
        out_shape=jax.ShapeDtypeStruct((G, n, n), x.dtype),
        grid=grid,
        in_specs=[pl.BlockSpec((gB, n, P), lambda i: (i, 0, 0))],
        out_specs=pl.BlockSpec((gB, n, n), lambda i: (i, 0, 0)),
        compiler_params=pltpu.CompilerParams(
            dimension_semantics=("parallel",),
        ),
    )(xg)                                          # (G, n, n)

    # Free reshape back to the reference layout (batch, epochs, n, n).
    return out.reshape(B, epochs, n, n)


def _e2r_ref(x, epochs):
    """Pure-JAX reference (mirrors the torch forward)."""
    x = jnp.squeeze(x)
    if x.ndim == 2:
        x = x[None]
    B, N, P = x.shape
    n = N // epochs
    xp = x.reshape(B, epochs, n, P)
    return jnp.einsum("benp,bemp->benm", xp, xp)


if __name__ == "__main__":
    key = jax.random.PRNGKey(0)
    B, N, P = 2, 16, 16       # small EEG-like: batch=2, 16 "rows", 16 features
    epochs = 2                # -> patches of n = 8 rows each
    x = jax.random.normal(key, (B, 1, N, P), dtype=jnp.float32)

    out = jax.block_until_ready(e2r_forward(x, epochs))
    ref = _e2r_ref(x, epochs)

    assert out.shape == (B, epochs, N // epochs, N // epochs), out.shape
    assert jnp.allclose(out, ref, atol=1e-5, rtol=1e-5), "mismatch vs reference"
    print("KERNEL_OK")
</pallas_src>

<mosaic_0001>
module attributes {stable_mosaic.version = 11 : i64} {
  func.func @_gram_kernel(%arg0: i32, %arg1: memref<4x8x16xf32, #tpu.memory_space<vmem>>, %arg2: memref<4x8x8xf32, #tpu.memory_space<vmem>>) attributes {dimension_semantics = [#tpu.dimension_semantics<parallel>], iteration_bounds = array<i64: 1>, scalar_prefetch = 0 : i64, scratch_operands = 0 : i64, tpu.core_type = #tpu.core_type<tc>, window_params = [{transform_indices = @transform_0, window_bounds = array<i64: 4, 8, 16>}, {transform_indices = @transform_1, window_bounds = array<i64: 4, 8, 8>}]} {
    %c0 = arith.constant 0 : index
    %c0_0 = arith.constant 0 : index
    %c0_1 = arith.constant 0 : index
    %0 = vector.load %arg1[%c0, %c0_0, %c0_1] : memref<4x8x16xf32, #tpu.memory_space<vmem>>, vector<4x8x16xf32>
    %cst = arith.constant dense<0.000000e+00> : vector<4x8x8xf32>
    %1 = tpu.matmul %0, %0, %cst {dimension_numbers = #tpu.dot_dimension_numbers<[2], [2], [1], [1], [0, 0, 0, 1, 1, 1], [0], [0]>} : vector<4x8x16xf32>, vector<4x8x16xf32>, vector<4x8x8xf32> -> vector<4x8x8xf32>
    %c0_2 = arith.constant 0 : index
    %c0_3 = arith.constant 0 : index
    %c0_4 = arith.constant 0 : index
    %2 = vector.load %arg2[%c0_2, %c0_3, %c0_4] : memref<4x8x8xf32, #tpu.memory_space<vmem>>, vector<4x8x8xf32>
    tpu.vector_store %arg2[%c0_2, %c0_3, %c0_4], %1 {strides = array<i32>} : memref<4x8x8xf32, #tpu.memory_space<vmem>>, vector<4x8x8xf32>,
    return
  }
  func.func @transform_0(%arg0: i32) -> (i32, i32, i32) {
    %c0_i32 = arith.constant 0 : i32
    %c0_i32_0 = arith.constant 0 : i32
    %c0_i32_1 = arith.constant 0 : i32
    return %arg0, %c0_i32, %c0_i32_0 : i32, i32, i32
  }
  func.func @transform_1(%arg0: i32) -> (i32, i32, i32) {
    %c0_i32 = arith.constant 0 : i32
    %c0_i32_0 = arith.constant 0 : i32
    %c0_i32_1 = arith.constant 0 : i32
    return %arg0, %c0_i32, %c0_i32_0 : i32, i32, i32
  }
}

</mosaic_0001>

<bundles_post_ra>
// kernel: tpu_custom_call.1
= control target key start
LH: loop header
LB: loop body
LE: loop exit
PB: predicated region body
PF: predicated region fallthrough
CT: control target
= control target key end

     0   :  { %6 = vsyncpa [#allocation3], 0  ;;  %s468_s0 = inlined_call_operand.hbm [shape: f32[4,8,16], index: 0, kind: input, shape index: {}]   ;;  %s469_s1 = inlined_call_operand.hbm [shape: f32[4,8,8], index: 1, kind: output, shape index: {}]  }
   0x1   :  { %7 = vsyncpa [#allocation4], 0  ;;  %s428_s6 = smov [#allocation2]  }
   0x2   :  { %s13_s7 = sshll.u32 %s428_s6, 4  ;;  %s14_s7 = int_to_ptr.vmem [resolvable:$true] %s13_s7 }
   0x3   :  { %s392_s8 = scalar_lea.vmem %s14_s7, 512  ;;  %p397_p1 = scmp.lt.s32.totalorder %s14_s7, %s14_s7 }
   0x4   :  { %p393_p0 = scmp.ne.s32.totalorder %s14_s7, %s392_s8  ;;  %p398_p2 = scmp.lt.s32.totalorder %s392_s8, %s392_s8 }
   0x6   :  { %p399_p3 = por %p398_p2, %p397_p1 }
   0x8   :  { %p400_p4 = pnand %p399_p3, %p393_p0 }
   0xa   :  { %403 = shalt.err (!%p400_p4)
}
   0xb   :  { %s429_s9 = smov 128   ;;  %s430_s10 = smov 8  }
   0xc   :  { %19 = dma.hbm_to_vmem [thread:$0]  %s468_s0, 512, %s14_s7, [#allocation3], %s429_s9, %s429_s9, %s430_s10  }
   0xd   :  { %424 = dma.done.wait [#allocation3], 512  }
   0xe   :  { %425 = vsyncadd [#allocation3], 4294966784  ;;  %v431_v0 = vmov 0.0   ;;  %vm432_vm0 = vmmov 0   ;;  %vm27_vm1 = vcmask 130048   ;;  %v23_v1 = vld [vmem:[#allocation2] sm:$0xff] }
   0xf   :  { %358 = vmatprep.subr.mxu0 %v431_v0  ;;  %363 = vmatprep.subr.mxu1 %v431_v0  ;;  %v24_v2 = vld [vmem:[#allocation2 + $0x8] sm:$0xff]  ;;  %v25_v3 = vld [vmem:[#allocation2 + $0x10] sm:$0xff]  ;;  %v26_v4 = vld [vmem:[#allocation2 + $0x18] sm:$0xff]  ;;  %vm320_vm2 = vcmask 64512   ;;  %s433_s0 = smov [#allocation5]  }
  0x10   :  { %360 = vmatprep.mubr.msk.f32.mxu0 %vm432_vm0, %v431_v0  ;;  %365 = vmatprep.mubr.msk.f32.mxu1 %vm432_vm0, %v431_v0  ;;  %s330_s13 = sshll.u32 %s433_s0, 4  ;;  %s331_s13 = int_to_ptr.vmem [resolvable:$true] %s330_s13 }
  0x11   :  { %359 = vmatpush3.xpose.msk.msra.mxu0 %vm27_vm1, %v23_v1  ;;  %364 = vmatpush3.xpose.msk.msra.mxu1 %vm27_vm1, %v24_v2  ;;  %s404_s14 = scalar_lea.vmem %s331_s13, 512  ;;  %p409_p6 = scmp.lt.s32.totalorder %s331_s13, %s331_s13 }
  0x12   :  { %368 = vmatprep.subr.mxu0 %v431_v0  ;;  %373 = vmatprep.subr.mxu1 %v431_v0  ;;  %p405_p5 = scmp.ne.s32.totalorder %s331_s13, %s404_s14  ;;  %p410_p7 = scmp.lt.s32.totalorder %s404_s14, %s404_s14 }
  0x14   :  { %361 = vmatmul.mubr.msk.f32.vlgmr.msra.gmra.mxu0 %vm27_vm1, %v23_v1  ;;  %366 = vmatmul.mubr.msk.f32.vlgmr.msra.gmra.mxu1 %vm27_vm1, %v24_v2  ;;  %p411_p8 = por %p410_p7, %p409_p6 }
  0x15   :  { %369 = vmatpush3.xpose.msk.msra.mxu0 %vm27_vm1, %v25_v3  ;;  %374 = vmatpush3.xpose.msk.msra.mxu1 %vm27_vm1, %v26_v4 }
  0x16   :  { %370 = vmatprep.mubr.msk.f32.mxu0 %vm432_vm0, %v431_v0  ;;  %375 = vmatprep.mubr.msk.f32.mxu1 %vm432_vm0, %v431_v0  ;;  %p412_p9 = pnand %p411_p8, %p405_p5 }
  0x18   :  { %371 = vmatmul.mubr.msk.f32.vlgmr.msra.gmra.mxu0 %vm27_vm1, %v25_v3  ;;  %376 = vmatmul.mubr.msk.f32.vlgmr.msra.gmra.mxu1 %vm27_vm1, %v26_v4 }
  0xd4   :  { %v97_v5 = vpop.f32.mrf.mxu0  ;;  %v170_v6 = vpop.f32.mrf.mxu1 }
  0xd5   :  { %321 = vst.msk [vmem:[#allocation5] sm:$0xff] %vm320_vm2, %v97_v5  ;;  %322 = vst.msk [vmem:[#allocation5 + $0x8] sm:$0xff] %vm320_vm2, %v170_v6 }
  0xd6   :  { %v362_v7 = vpop.f32.mrf.mxu0  ;;  %v367_v8 = vpop.f32.mrf.mxu1 }
  0xd8   :  { %v243_v9 = vpop.f32.mrf.mxu0  ;;  %v316_v10 = vpop.f32.mrf.mxu1 }
  0xd9   :  { %323 = vst.msk [vmem:[#allocation5 + $0x10] sm:$0xff] %vm320_vm2, %v243_v9  ;;  %324 = vst.msk [vmem:[#allocation5 + $0x18] sm:$0xff] %vm320_vm2, %v316_v10 }
  0xda   :  { %v372_v11 = vpop.f32.mrf.mxu0  ;;  %v377_v12 = vpop.f32.mrf.mxu1 }
  0xdb   :  { %415 = shalt.err (!%p412_p9)
}
  0xdc   :  { %336 = dma.vmem_to_hbm [thread:$0]  %s331_s13, 512, %s469_s1, [#allocation4], %s429_s9, %s429_s9, %s430_s10  }
  0xdd   :  { %426 = dma.done.wait [#allocation4], 512  }
  0xde   :  { %427 = vsyncadd [#allocation4], 4294966784 }
  0xdf   :  { %340 = vsyncpa [#allocation3], 1 }
  0xe0   :  { %341 = vsyncpa [#allocation4], 1 }

</bundles_post_ra>
